<compile_context>
chip_gen: v7x
topology: tpu7x:2x2x1
jax: 0.10.0
libtpu: 0.0.40
codegen_flags: <defaults>
</compile_context>

<pallas_src>
import jax
import jax.numpy as jnp
import numpy as np
from jax.experimental import pallas as pl
from jax.experimental.pallas import tpu as pltpu


def _round_up(n, m):
    return ((n + m - 1) // m) * m


def _topk_linear_kernel(kth_ref, pre_w_ref, sign_ref, x_ref, o_ref, w_t_ref):
    """Grid = (o_tiles, b_tiles); b (program_id(1)) is the fast axis.

    kth_ref  : (TO, 1)   f32   K-th largest pre_w per output row
    pre_w_ref: (TO, I)   f32
    sign_ref : (TO, I)   int8  (+/-1)
    x_ref    : (TB, I)   f32
    o_ref    : (TB, TO)  f32
    w_t_ref  : (I, TO)   VMEM scratch, pruned weight transposed, reused over b
    """
    # Build the pruned, transposed weight once per O-tile; reuse for all b.
    @pl.when(pl.program_id(1) == 0)
    def _():
        pre_w = pre_w_ref[...]                                   # (TO, I)
        mask = pre_w >= kth_ref[...]                             # single compare
        pruned = jnp.where(
            mask, jnp.exp(pre_w) * sign_ref[...].astype(jnp.float32), 0.0)
        w_t_ref[...] = pruned.T.astype(w_t_ref.dtype)            # (I, TO)

    # MXU-native matmul; accumulate in f32.
    o_ref[...] = jnp.dot(
        x_ref[...].astype(w_t_ref.dtype), w_t_ref[...],
        preferred_element_type=jnp.float32).astype(o_ref.dtype)


def topk_linear(x, pre_w, sign, K, *, tile_o=128, tile_b=128,
                matmul_dtype=jnp.float32):
    """TopKLinear.forward (param_space='log').

    matmul_dtype=jnp.bfloat16 halves matmul-operand bytes and runs the MXU at
    full rate (only if ~1e-3 relative error is acceptable); default keeps f32
    for exact fidelity to the PyTorch module.
    """
    x = jnp.asarray(x, jnp.float32)
    pre_w = jnp.asarray(pre_w, jnp.float32)
    B, I = x.shape
    O, I2 = pre_w.shape
    assert I == I2, "in_features mismatch"
    assert isinstance(K, int) and 1 <= K <= I, "need 1 <= K <= in_features"

    # Per-row K-th largest value -> in-kernel mask is a single compare.
    kth = jax.lax.top_k(pre_w, K)[0][:, K - 1:K]                 # (O, 1)

    # Tiling: lane-dense output (TO mult of 128), TB mult of 8, I padded to 128.
    I_pad = _round_up(I, 128)
    TB = min(tile_b, _round_up(B, 8))
    B_pad = _round_up(B, TB)
    TO = min(tile_o, _round_up(O, 128))
    O_pad = _round_up(O, TO)

    NEG, POS = jnp.float32(-1e30), jnp.float32(1e30)
    pre_w_p = jnp.full((O_pad, I_pad), NEG, jnp.float32).at[:O, :I].set(pre_w)
    kth_p = jnp.full((O_pad, 1), POS, jnp.float32).at[:O, :].set(kth)
    sign_p = jnp.zeros((O_pad, I_pad), jnp.int8).at[:O, :I].set(
        jnp.asarray(sign, jnp.float32).astype(jnp.int8))
    x_p = jnp.zeros((B_pad, I_pad), jnp.float32).at[:B, :I].set(x)

    grid = (O_pad // TO, B_pad // TB)                            # o outer, b inner

    # VMEM budget: double-buffered blocks + persistent scratch, capped so the
    # same config fits v7x's 64 MiB VMEM with headroom.
    acc_itemsize = jnp.dtype(matmul_dtype).itemsize
    vmem_bytes = (2 * (TO * I_pad * 4 + TO * I_pad * 1 + TB * I_pad * 4
                       + TB * TO * 4 + TO * 4)
                  + I_pad * TO * acc_itemsize)
    vmem_limit = int(min(max(2 * vmem_bytes, 32 * 1024 * 1024),
                         48 * 1024 * 1024))

    out = pl.pallas_call(
        _topk_linear_kernel,
        out_shape=jax.ShapeDtypeStruct((B_pad, O_pad), jnp.float32),
        grid_spec=pltpu.PrefetchScalarGridSpec(
            num_scalar_prefetch=0,
            grid=grid,
            in_specs=[
                pl.BlockSpec((TO, 1), lambda o, b: (o, 0)),       # kth
                pl.BlockSpec((TO, I_pad), lambda o, b: (o, 0)),   # pre_w
                pl.BlockSpec((TO, I_pad), lambda o, b: (o, 0)),   # sign (int8)
                pl.BlockSpec((TB, I_pad), lambda o, b: (b, 0)),   # x
            ],
            out_specs=pl.BlockSpec((TB, TO), lambda o, b: (b, o)),
            scratch_shapes=[pltpu.VMEM((I_pad, TO), matmul_dtype)],
        ),
        compiler_params=pltpu.CompilerParams(
            dimension_semantics=("parallel", "arbitrary"),
            vmem_limit_bytes=vmem_limit,
        ),
    )(kth_p, pre_w_p, sign_p, x_p)

    return out[:B, :O]


def _reference(x, pre_w, sign, K):
    """Pure-JAX reference of TopKLinear.forward, exact torch.topk-style mask."""
    O = pre_w.shape[0]
    _, idx = jax.lax.top_k(pre_w, K)
    mask = jnp.zeros_like(pre_w).at[jnp.arange(O)[:, None], idx].set(1.0)
    pruned_w = mask * jnp.exp(pre_w) * sign
    return jnp.matmul(x, pruned_w.T, precision=jax.lax.Precision.HIGHEST)


if __name__ == "__main__":
    key = jax.random.PRNGKey(0)

    def make_case(k, B, IN, OUT, K):
        k_x, k_w, k_s = jax.random.split(k, 3)
        x = jax.random.normal(k_x, (B, IN), dtype=jnp.float32)
        # pre_w: xavier_normal_ -> N(0, sqrt(2/(fan_in+fan_out)))
        std = float(np.sqrt(2.0 / (IN + OUT)))
        pre_w = std * jax.random.normal(k_w, (OUT, IN), dtype=jnp.float32)
        # corelease_sign: uniform(-1,1).sign() -> random +/-1 matrix
        sign = jnp.sign(jax.random.uniform(k_s, (OUT, IN), minval=-1.0, maxval=1.0))
        sign = jnp.where(sign == 0, 1.0, sign).astype(jnp.float32)
        return x, pre_w, sign, K

    k1, k2 = jax.random.split(key)

    # Case 1: small shapes consistent with the module docstring.
    x, pre_w, sign, K = make_case(k1, B=8, IN=32, OUT=16, K=4)
    y = jax.block_until_ready(topk_linear(x, pre_w, sign, K))
    np.testing.assert_allclose(np.asarray(y), np.asarray(_reference(x, pre_w, sign, K)),
                               rtol=1e-4, atol=1e-4)

    # Case 2: multi-tile grid (3 O-tiles x 2 B-tiles) exercising the per-O-tile
    # pruning cache, padding, and the megacore-parallel O axis.
    x2, pre_w2, sign2, K2 = make_case(k2, B=16, IN=160, OUT=300, K=7)
    y2 = jax.block_until_ready(topk_linear(x2, pre_w2, sign2, K2, tile_b=8))
    np.testing.assert_allclose(np.asarray(y2),
                               np.asarray(_reference(x2, pre_w2, sign2, K2)),
                               rtol=1e-4, atol=1e-4)

    print("KERNEL_OK")
</pallas_src>

<mosaic_0001>
module attributes {stable_mosaic.version = 11 : i64} {
  func.func @_topk_linear_kernel(%arg0: i32, %arg1: i32, %arg2: memref<128x1xf32, #tpu.memory_space<vmem>>, %arg3: memref<128x128xf32, #tpu.memory_space<vmem>>, %arg4: memref<128x128xi8, #tpu.memory_space<vmem>>, %arg5: memref<8x128xf32, #tpu.memory_space<vmem>>, %arg6: memref<8x128xf32, #tpu.memory_space<vmem>>, %arg7: memref<128x128xf32, #tpu.memory_space<vmem>>) attributes {dimension_semantics = [#tpu.dimension_semantics<parallel>, #tpu.dimension_semantics<arbitrary>], iteration_bounds = array<i64: 1, 1>, scalar_prefetch = 0 : i64, scratch_operands = 1 : i64, tpu.core_type = #tpu.core_type<tc>, window_params = [{transform_indices = @transform_0, window_bounds = array<i64: 128, 1>}, {transform_indices = @transform_1, window_bounds = array<i64: 128, 128>}, {transform_indices = @transform_2, window_bounds = array<i64: 128, 128>}, {transform_indices = @transform_3, window_bounds = array<i64: 8, 128>}, {transform_indices = @transform_4, window_bounds = array<i64: 8, 128>}]} {
    %c0_i32 = arith.constant 0 : i32
    %0 = arith.cmpi eq, %arg1, %c0_i32 : i32
    %1 = arith.extui %0 : i1 to i32
    %c0_i32_0 = arith.constant 0 : i32
    %2 = arith.cmpi ne, %1, %c0_i32_0 : i32
    scf.if %2 {
      %c0_6 = arith.constant 0 : index
      %c0_7 = arith.constant 0 : index
      %7 = vector.load %arg3[%c0_6, %c0_7] : memref<128x128xf32, #tpu.memory_space<vmem>>, vector<128x128xf32>
      %c0_8 = arith.constant 0 : index
      %c0_9 = arith.constant 0 : index
      %8 = vector.load %arg2[%c0_8, %c0_9] : memref<128x1xf32, #tpu.memory_space<vmem>>, vector<128x1xf32>
      %9 = vector.broadcast %8 : vector<128x1xf32> to vector<128x128xf32>
      %10 = arith.cmpf oge, %7, %9 : vector<128x128xf32>
      %11 = math.exp %7 : vector<128x128xf32>
      %c0_10 = arith.constant 0 : index
      %c0_11 = arith.constant 0 : index
      %12 = vector.load %arg4[%c0_10, %c0_11] : memref<128x128xi8, #tpu.memory_space<vmem>>, vector<128x128xi8>
      %13 = arith.sitofp %12 : vector<128x128xi8> to vector<128x128xf32>
      %14 = arith.mulf %11, %13 : vector<128x128xf32>
      %cst_12 = arith.constant 0.000000e+00 : f32
      %15 = vector.broadcast %cst_12 : f32 to vector<128x128xf32>
      %16 = arith.select %10, %14, %15 : vector<128x128xi1>, vector<128x128xf32>
      %17 = tpu.transpose %16, [1, 0] : vector<128x128xf32> -> vector<128x128xf32>
      %c0_13 = arith.constant 0 : index
      %c0_14 = arith.constant 0 : index
      %18 = vector.load %arg7[%c0_13, %c0_14] : memref<128x128xf32, #tpu.memory_space<vmem>>, vector<128x128xf32>
      tpu.vector_store %arg7[%c0_13, %c0_14], %17 {strides = array<i32>} : memref<128x128xf32, #tpu.memory_space<vmem>>, vector<128x128xf32>,
    } else {
    }
    %c0 = arith.constant 0 : index
    %c0_1 = arith.constant 0 : index
    %3 = vector.load %arg5[%c0, %c0_1] : memref<8x128xf32, #tpu.memory_space<vmem>>, vector<8x128xf32>
    %c0_2 = arith.constant 0 : index
    %c0_3 = arith.constant 0 : index
    %4 = vector.load %arg7[%c0_2, %c0_3] : memref<128x128xf32, #tpu.memory_space<vmem>>, vector<128x128xf32>
    %cst = arith.constant dense<0.000000e+00> : vector<8x128xf32>
    %5 = tpu.matmul %3, %4, %cst {dimension_numbers = #tpu.dot_dimension_numbers<[1], [0], [0], [1], [0, 0, 1, 1], [], []>} : vector<8x128xf32>, vector<128x128xf32>, vector<8x128xf32> -> vector<8x128xf32>
    %c0_4 = arith.constant 0 : index
    %c0_5 = arith.constant 0 : index
    %6 = vector.load %arg6[%c0_4, %c0_5] : memref<8x128xf32, #tpu.memory_space<vmem>>, vector<8x128xf32>
    tpu.vector_store %arg6[%c0_4, %c0_5], %5 {strides = array<i32>} : memref<8x128xf32, #tpu.memory_space<vmem>>, vector<8x128xf32>,
    return
  }
  func.func @transform_0(%arg0: i32, %arg1: i32) -> (i32, i32) {
    %c0_i32 = arith.constant 0 : i32
    %c0_i32_0 = arith.constant 0 : i32
    return %arg0, %c0_i32 : i32, i32
  }
  func.func @transform_1(%arg0: i32, %arg1: i32) -> (i32, i32) {
    %c0_i32 = arith.constant 0 : i32
    %c0_i32_0 = arith.constant 0 : i32
    return %arg0, %c0_i32 : i32, i32
  }
  func.func @transform_2(%arg0: i32, %arg1: i32) -> (i32, i32) {
    %c0_i32 = arith.constant 0 : i32
    %c0_i32_0 = arith.constant 0 : i32
    return %arg0, %c0_i32 : i32, i32
  }
  func.func @transform_3(%arg0: i32, %arg1: i32) -> (i32, i32) {
    %c0_i32 = arith.constant 0 : i32
    %c0_i32_0 = arith.constant 0 : i32
    return %arg1, %c0_i32 : i32, i32
  }
  func.func @transform_4(%arg0: i32, %arg1: i32) -> (i32, i32) {
    %c0_i32 = arith.constant 0 : i32
    return %arg1, %arg0 : i32, i32
  }
}

</mosaic_0001>

<bundles_post_ra>
// kernel: tpu_custom_call.1
= control target key start
LH: loop header
LB: loop body
LE: loop exit
PB: predicated region body
PF: predicated region fallthrough
CT: control target
= control target key end

     0   :  { %9 = vsyncpa [#allocation4], 0  ;;  %s773_s0 = inlined_call_operand.vmem [shape: f32[128,1], index: 0, kind: input, shape index: {}]   ;;  %s774_s1 = inlined_call_operand.vmem [shape: f32[128,128], index: 1, kind: input, shape index: {}]   ;;  %s775_s2 = inlined_call_operand.hbm [shape: s8[128,128], index: 2, kind: input, shape index: {}]   ;;  %s776_s3 = inlined_call_operand.vmem [shape: f32[8,128], index: 3, kind: input, shape index: {}]   ;;  %s777_s4 = inlined_call_operand.hbm [shape: f32[8,128], index: 4, kind: output, shape index: {}]  }
   0x1   :  { %10 = vsyncpa [#allocation5], 0  ;;  %s581_s15 = smov [#allocation3]   ;;  %s533_s19 = scalar_lea.hbm %s775_s2, 512 }
   0x2   :  { %s20_s16 = sshll.u32 %s581_s15, 4  ;;  %p534_p0 = scmp.ne.s32.totalorder %s775_s2, %s533_s19  ;;  %s21_s16 = int_to_ptr.vmem [resolvable:$true] %s20_s16 }
   0x3   :  { %p537_p1 = scmp.lt.u32.totalorder %s533_s19, %s775_s2 }
   0x5   :  { %p539_p2 = pnand %p537_p1, %p534_p0 }
   0x7   :  { %542 = shalt.err (!%p539_p2)
}
   0x8   :  { %s543_s24 = scalar_lea.vmem %s21_s16, 512  ;;  %p548_p4 = scmp.lt.s32.totalorder %s21_s16, %s21_s16 }
   0x9   :  { %p544_p3 = scmp.ne.s32.totalorder %s21_s16, %s543_s24  ;;  %p549_p5 = scmp.lt.s32.totalorder %s543_s24, %s543_s24 }
   0xb   :  { %p550_p6 = por %p549_p5, %p548_p4 }
   0xd   :  { %p551_p7 = pnand %p550_p6, %p544_p3 }
   0xf   :  { %554 = shalt.err (!%p551_p7)
}
  0x10   :  { %s582_s25 = smov 128   ;;  %s583_s26 = smov 8  }
  0x11   :  { %26 = dma.hbm_to_vmem [thread:$0]  %s775_s2, 512, %s21_s16, [#allocation4], %s582_s25, %s582_s25, %s583_s26  }
  0x12   :  { %577 = dma.done.wait [#allocation4], 512  }
  0x13   :  { %578 = vsyncadd [#allocation4], 4294966784  ;;  %v584_v0 = vmov 0   ;;  %v54_v1 = vld [vmem:[%s773_s0 + $0x10] sm:$0xff]  ;;  %v52_v2 = vld [vmem:[%s773_s0] sm:$0xff]  ;;  %v585_v57 = vmov 0.0|0.0  }
  0x14   :  { %500 = vset.pattern.permute.xlu1 %v584_v0  ;;  %499 = vset.pattern.permute.xlu0 %v584_v0  ;;  %v55_v3 = vld [vmem:[%s773_s0 + $0x18] sm:$0xff]  ;;  %v53_v4 = vld [vmem:[%s773_s0 + $0x8] sm:$0xff]  ;;  %v56_v6 = vld [vmem:[%s773_s0 + $0x20] sm:$0xff]  ;;  %s588_s12 = smov [#allocation6]  }
  0x15   :  { %80 = vperm.xlu1 %500, %v54_v1   ;;  %70 = vperm.xlu0 %499, %v52_v2   ;;  %v57_v5 = vld [vmem:[%s773_s0 + $0x28] sm:$0xff]  ;;  %v59_v7 = vld [vmem:[%s773_s0 + $0x38] sm:$0xff]  ;;  %v58_v8 = vld [vmem:[%s773_s0 + $0x30] sm:$0xff] }
  0x16   :  { %v61_v9 = vld [vmem:[%s773_s0 + $0x48] sm:$0xff]  ;;  %v60_v10 = vld [vmem:[%s773_s0 + $0x40] sm:$0xff]  ;;  %v63_v11 = vld [vmem:[%s773_s0 + $0x58] sm:$0xff]  ;;  %467 = vmatprep.subr.bf16.mxu0 %v585_v57 }
  0x17   :  { %v62_v12 = vld [vmem:[%s773_s0 + $0x50] sm:$0xff]  ;;  %v65_v13 = vld [vmem:[%s773_s0 + $0x68] sm:$0xff]  ;;  %v64_v14 = vld [vmem:[%s773_s0 + $0x60] sm:$0xff] }
  0x18   :  { %v67_v15 = vld [vmem:[%s773_s0 + $0x78] sm:$0xff]  ;;  %v66_v16 = vld [vmem:[%s773_s0 + $0x70] sm:$0xff]  ;;  %v36_v17 = vld [vmem:[%s774_s1] sm:$0xff]  ;;  %s406_s0 = sshll.u32 %s588_s12, 4  ;;  %s407_s0 = int_to_ptr.vmem [resolvable:$true] %s406_s0 }
  0x19   :  { %85 = vperm.xlu1 %500, %v55_v3   ;;  %75 = vperm.xlu0 %499, %v53_v4   ;;  %v164_v18 = vmul.f32 1.442695, %v36_v17  ;;  %v37_v19 = vld [vmem:[%s774_s1 + $0x8] sm:$0xff]  ;;  %v38_v20 = vld [vmem:[%s774_s1 + $0x10] sm:$0xff]  ;;  %v39_v25 = vld [vmem:[%s774_s1 + $0x18] sm:$0xff]  ;;  %s555_s13 = scalar_lea.vmem %s407_s0, 128  ;;  %p560_p9 = scmp.lt.s32.totalorder %s407_s0, %s407_s0 }
  0x1a   :  { %v166_v21 = vmul.f32 1.442695, %v37_v19  ;;  %v196_v22 = vld [vmem:[#allocation3] sm:$0xff]  ;;  %v168_v23 = vmul.f32 1.442695, %v38_v20  ;;  %v689_v29 = vld [vmem:[%s774_s1 + $0x20] sm:$0xff]  ;;  %p556_p8 = scmp.ne.s32.totalorder %s407_s0, %s555_s13  ;;  %p561_p10 = scmp.lt.s32.totalorder %s555_s13, %s555_s13 }
  0x1b   :  { %501 = vpow2.f32 %v164_v18  ;;  %v200_v24 = vunpack.c.0.s8 %v196_v22  ;;  %v170_v26 = vmul.f32 1.442695, %v39_v25  ;;  %v201_v28 = vunpack.c.1.s8 %v196_v22  ;;  %v695_v35 = vld [vmem:[%s774_s1 + $0x28] sm:$0xff]  ;;  %v701_v44 = vld [vmem:[%s774_s1 + $0x30] sm:$0xff]  ;;  %v707_v53 = vld [vmem:[%s774_s1 + $0x38] sm:$0xff] }
  0x1c   :  { %503 = vpow2.f32 %v166_v21  ;;  %v202_v31 = vunpack.c.2.s8 %v196_v22  ;;  %v172_v32 = vmul.f32 1.442695, %v689_v29  ;;  %v174_v40 = vmul.f32 1.442695, %v695_v35  ;;  %v197_v45 = vld [vmem:[#allocation3 + $0x8] sm:$0xff]  ;;  %v714_v62 = vld [vmem:[%s774_s1 + $0x40] sm:$0xff]  ;;  %p562_p11 = por %p561_p10, %p560_p9 }
  0x1d   :  { %95 = vperm.xlu1 %500, %v57_v5   ;;  %90 = vperm.xlu0 %499, %v56_v6   ;;  %505 = vpow2.f32 %v168_v23  ;;  %v216_v27 = vcvt.s32.f32 %v200_v24  ;;  %v217_v34 = vcvt.s32.f32 %v201_v28  ;;  %v203_v42 = vunpack.c.3.s8 %v196_v22  ;;  %v720_v6 = vld [vmem:[%s774_s1 + $0x48] sm:$0xff]  ;;  %v47_v23 = vld [vmem:[%s774_s1 + $0x58] sm:$0xff] }
  0x1e   :  { %507 = vpow2.f32 %v170_v26  ;;  %v218_v37 = vcvt.s32.f32 %v202_v31  ;;  %v176_v49 = vmul.f32 1.442695, %v701_v44  ;;  %v204_v52 = vunpack.c.0.s8 %v197_v45  ;;  %v48_v31 = vld [vmem:[%s774_s1 + $0x60] sm:$0xff]  ;;  %p563_p12 = pnand %p562_p11, %p556_p8 }
  0x1f   :  { %509 = vpow2.f32 %v172_v32  ;;  %v219_v50 = vcvt.s32.f32 %v203_v42  ;;  %v178_v56 = vmul.f32 1.442695, %v707_v53  ;;  %v205_v60 = vunpack.c.1.s8 %v197_v45 }
  0x20   :  { %511 = vpow2.f32 %v174_v40  ;;  %v220_v61 = vcvt.s32.f32 %v204_v52  ;;  %v180_v1 = vmul.f32 1.442695, %v714_v62  ;;  %v206_v5 = vunpack.c.2.s8 %v197_v45 }
  0x21   :  { %105 = vperm.xlu1 %500, %v59_v7   ;;  %100 = vperm.xlu0 %499, %v58_v8   ;;  %513 = vpow2.f32 %v176_v49  ;;  %v221_v3 = vcvt.s32.f32 %v205_v60  ;;  %v186_v26 = vmul.f32 1.442695, %v47_v23  ;;  %v199_v49 = vld [vmem:[#allocation3 + $0x18] sm:$0xff] }
  0x22   :  { %515 = vpow2.f32 %v178_v56  ;;  %v51_v56 = vld [vmem:[%s774_s1 + $0x78] sm:$0xff] }
  0x23   :  { %517 = vpow2.f32 %v180_v1  ;;  %v194_v60 = vmul.f32 1.442695, %v51_v56 }
  0x25   :  { %115 = vperm.xlu1 %500, %v61_v9   ;;  %110 = vperm.xlu0 %499, %v60_v10   ;;  %v502_v30 = vpop.eup %501  ;;  %v182_v9 = vmul.f32 1.442695, %v720_v6 }
  0x26   :  { %v232_v33 = vmul.f32 %v502_v30, %v216_v27  ;;  %v504_v36 = vpop.eup %503 }
  0x27   :  { %v506_v39 = vpop.eup %505  ;;  %v233_v43 = vmul.f32 %v504_v36, %v217_v34  ;;  %519 = vpow2.f32 %v182_v9  ;;  %v188_v34 = vmul.f32 1.442695, %v48_v31 }
  0x28   :  { %v234_v47 = vmul.f32 %v506_v39, %v218_v37  ;;  %v508_v54 = vpop.eup %507  ;;  %v49_v39 = vld [vmem:[%s774_s1 + $0x68] sm:$0xff] }
  0x29   :  { %125 = vperm.xlu1 %500, %v63_v11   ;;  %120 = vperm.xlu0 %499, %v62_v12   ;;  %v235_v59 = vmul.f32 %v508_v54, %v219_v50  ;;  %v510_v63 = vpop.eup %509  ;;  %v207_v12 = vunpack.c.3.s8 %v197_v45  ;;  %v190_v42 = vmul.f32 1.442695, %v49_v39 }
  0x2a   :  { %v236_v4 = vmul.f32 %v510_v63, %v220_v61  ;;  %v512_v7 = vpop.eup %511  ;;  %v213_v63 = vunpack.c.1.s8 %v199_v49 }
  0x2b   :  { %v237_v10 = vmul.f32 %v512_v7, %v221_v3 }
  0x2d   :  { %135 = vperm.xlu1 %500, %v65_v13   ;;  %130 = vperm.xlu0 %499, %v64_v14   ;;  %v222_v13 = vcvt.s32.f32 %v206_v5  ;;  %v727_v14 = vld [vmem:[%s774_s1 + $0x50] sm:$0xff] }
  0x2e   :  { %v184_v18 = vmul.f32 1.442695, %v727_v14 }
  0x30   :  { %521 = vpow2.f32 %v184_v18 }
  0x31   :  { %145 = vperm.xlu1 %500, %v67_v15   ;;  %140 = vperm.xlu0 %499, %v66_v16   ;;  %v514_v15 = vpop.eup %513  ;;  %v198_v16 = vld [vmem:[#allocation3 + $0x10] sm:$0xff]  ;;  %523 = vpow2.f32 %v186_v26 }
  0x32   :  { %v238_v21 = vmul.f32 %v514_v15, %v222_v13  ;;  %v208_v22 = vunpack.c.0.s8 %v198_v16  ;;  %v516_v24 = vpop.eup %515  ;;  %525 = vpow2.f32 %v188_v34  ;;  %v211_v45 = vunpack.c.3.s8 %v198_v16 }
  0x33   :  { %v518_v32 = vpop.eup %517  ;;  %527 = vpow2.f32 %v190_v42 }
  0x34   :  { %v224_v30 = vcvt.s32.f32 %v208_v22  ;;  %v520_v40 = vpop.eup %519 }
  0x36   :  { %v240_v37 = vmul.f32 %v518_v32, %v224_v30 }
  0x94   :  { %v71_v38 = vpop.permute.xlu0 %70  ;;  %v81_v46 = vpop.permute.xlu1 %80 }
  0x95   :  { %vm148_vm0 = vcmp.ge.f32.partialorder %v36_v17, %v71_v38  ;;  %vm150_vm1 = vcmp.ge.f32.partialorder %v38_v20, %v81_v46  ;;  %v223_v20 = vcvt.s32.f32 %v207_v12  ;;  %v210_v38 = vunpack.c.2.s8 %v198_v16 }
  0x96   :  { %v248_v41 = vsel %vm148_vm0, %v232_v33, 0.0  ;;  %v250_v55 = vsel %vm150_vm1, %v234_v47, 0.0  ;;  %v50_v47 = vld [vmem:[%s774_s1 + $0x70] sm:$0xff]  ;;  %vm586_vm0 = vmmov 0  }
  0x97   :  { %264 = vxpose.xlu0.b32.start [1/16] %v248_v41, 128  ;;  %v239_v27 = vmul.f32 %v516_v24, %v223_v20  ;;  %v226_v46 = vcvt.s32.f32 %v210_v38 }
  0x98   :  { %v76_v48 = vpop.permute.xlu0 %75  ;;  %v86_v58 = vpop.permute.xlu1 %85 }
  0x99   :  { %vm149_vm2 = vcmp.ge.f32.partialorder %v37_v19, %v76_v48  ;;  %vm151_vm3 = vcmp.ge.f32.partialorder %v39_v25, %v86_v58  ;;  %v522_v48 = vpop.eup %521 }
  0x9a   :  { %v249_v51 = vsel %vm149_vm2, %v233_v43, 0.0  ;;  %v251_v2 = vsel %vm151_vm3, %v235_v59, 0.0  ;;  %v242_v54 = vmul.f32 %v522_v48, %v226_v46  ;;  %v524_v58 = vpop.eup %523  ;;  %v312_v48 = vld [vmem:[%s776_s3] sm:$0xff] }
  0x9b   :  { %265 = vxpose.xlu0.b32.cont [2/16] %v249_v51, 128  ;;  %v192_v51 = vmul.f32 1.442695, %v50_v47  ;;  %v526_v1 = vpop.eup %525 }
  0x9c   :  { %v91_v0 = vpop.permute.xlu0 %90  ;;  %v96_v8 = vpop.permute.xlu1 %95 }
  0x9d   :  { %vm152_vm4 = vcmp.ge.f32.partialorder %v689_v29, %v91_v0  ;;  %vm153_vm5 = vcmp.ge.f32.partialorder %v695_v35, %v96_v8  ;;  %v209_v29 = vunpack.c.1.s8 %v198_v16  ;;  %529 = vpow2.f32 %v192_v51  ;;  %v528_v7 = vpop.eup %527 }
  0x9e   :  { %v252_v11 = vsel %vm152_vm4, %v236_v4, 0.0  ;;  %v253_v19 = vsel %vm153_vm5, %v237_v10, 0.0  ;;  %531 = vpow2.f32 %v194_v60  ;;  %v229_v4 = vcvt.s32.f32 %v213_v63 }
  0x9f   :  { %266 = vxpose.xlu0.b32.cont [3/16] %v250_v55, 128  ;;  %v225_v36 = vcvt.s32.f32 %v209_v29  ;;  %v212_v55 = vunpack.c.0.s8 %v199_v49 }
  0xa0   :  { %v101_v17 = vpop.permute.xlu0 %100  ;;  %v106_v25 = vpop.permute.xlu1 %105  ;;  %v245_v9 = vmul.f32 %v528_v7, %v229_v4 }
  0xa1   :  { %vm154_vm6 = vcmp.ge.f32.partialorder %v701_v44, %v101_v17  ;;  %vm155_vm7 = vcmp.ge.f32.partialorder %v707_v53, %v106_v25  ;;  %v241_v43 = vmul.f32 %v520_v40, %v225_v36  ;;  %v227_v53 = vcvt.s32.f32 %v211_v45 }
  0xa2   :  { %v254_v28 = vsel %vm154_vm6, %v238_v21, 0.0  ;;  %v255_v35 = vsel %vm155_vm7, %v239_v27, 0.0  ;;  %v228_v0 = vcvt.s32.f32 %v212_v55 }
  0xa3   :  { %267 = vxpose.xlu0.b32.cont [4/16] %v251_v2, 128  ;;  %v243_v61 = vmul.f32 %v524_v58, %v227_v53 }
  0xa4   :  { %v111_v33 = vpop.permute.xlu0 %110  ;;  %v116_v41 = vpop.permute.xlu1 %115  ;;  %v244_v5 = vmul.f32 %v526_v1, %v228_v0 }
  0xa5   :  { %vm156_vm8 = vcmp.ge.f32.partialorder %v714_v62, %v111_v33  ;;  %vm157_vm9 = vcmp.ge.f32.partialorder %v720_v6, %v116_v41  ;;  %v214_v6 = vunpack.c.2.s8 %v199_v49 }
  0xa6   :  { %v256_v44 = vsel %vm156_vm8, %v240_v37, 0.0  ;;  %v257_v52 = vsel %vm157_vm9, %v241_v43, 0.0 }
  0xa7   :  { %268 = vxpose.xlu0.b32.cont [5/16] %v252_v11, 128  ;;  %v215_v11 = vunpack.c.3.s8 %v199_v49  ;;  %v230_v12 = vcvt.s32.f32 %v214_v6  ;;  %v530_v13 = vpop.eup %529 }
  0xa8   :  { %v121_v50 = vpop.permute.xlu0 %120  ;;  %v126_v59 = vpop.permute.xlu1 %125 }
  0xa9   :  { %vm158_vm10 = vcmp.ge.f32.partialorder %v727_v14, %v121_v50  ;;  %vm159_vm11 = vcmp.ge.f32.partialorder %v47_v23, %v126_v59  ;;  %v231_v16 = vcvt.s32.f32 %v215_v11  ;;  %v246_v17 = vmul.f32 %v530_v13, %v230_v12  ;;  %v532_v18 = vpop.eup %531 }
  0xaa   :  { %v258_v62 = vsel %vm158_vm10, %v242_v54, 0.0  ;;  %v259_v3 = vsel %vm159_vm11, %v243_v61, 0.0  ;;  %v587_v23 = vmov 0.0  }
  0xab   :  { %269 = vxpose.xlu0.b32.cont [6/16] %v253_v19, 128  ;;  %v247_v20 = vmul.f32 %v532_v18, %v231_v16  ;;  %464 = vmatprep.mubr.msk.f32.mxu0 %vm586_vm0, %v587_v23 }
  0xac   :  { %v131_v2 = vpop.permute.xlu0 %130  ;;  %v136_v8 = vpop.permute.xlu1 %135 }
  0xad   :  { %vm160_vm12 = vcmp.ge.f32.partialorder %v48_v31, %v131_v2  ;;  %vm161_vm13 = vcmp.ge.f32.partialorder %v49_v39, %v136_v8 }
  0xae   :  { %v260_v10 = vsel %vm160_vm12, %v244_v5, 0.0  ;;  %v261_v15 = vsel %vm161_vm13, %v245_v9, 0.0 }
  0xaf   :  { %270 = vxpose.xlu0.b32.cont [7/16] %v254_v28, 128 }
  0xb0   :  { %v141_v14 = vpop.permute.xlu0 %140  ;;  %v146_v19 = vpop.permute.xlu1 %145 }
  0xb1   :  { %vm162_vm14 = vcmp.ge.f32.partialorder %v50_v47, %v141_v14  ;;  %vm163_vm15 = vcmp.ge.f32.partialorder %v51_v56, %v146_v19 }
  0xb2   :  { %v262_v21 = vsel %vm162_vm14, %v246_v17, 0.0  ;;  %v263_v22 = vsel %vm163_vm15, %v247_v20, 0.0 }
  0xb3   :  { %271 = vxpose.xlu0.b32.cont [8/16] %v255_v35, 128 }
  0xb7   :  { %272 = vxpose.xlu0.b32.cont [9/16] %v256_v44, 128 }
  0xbb   :  { %273 = vxpose.xlu0.b32.cont [10/16] %v257_v52, 128 }
  0xbf   :  { %274 = vxpose.xlu0.b32.cont [11/16] %v258_v62, 128 }
  0xc3   :  { %275 = vxpose.xlu0.b32.cont [12/16] %v259_v3, 128 }
  0xc7   :  { %276 = vxpose.xlu0.b32.cont [13/16] %v260_v10, 128 }
  0xcb   :  { %277 = vxpose.xlu0.b32.cont [14/16] %v261_v15, 128 }
  0xcf   :  { %278 = vxpose.xlu0.b32.cont [15/16] %v262_v21, 128 }
  0xd3   :  { %279 = vxpose.xlu0.b32.end [16/16] %v263_v22, 128 }
 0x117   :  { %v280_v24 = vpop.trf.xlu0 }
 0x11b   :  { %v281_v25 = vpop.trf.xlu0 }
 0x11c   :  { %v468_v26 = vpack.c.bf16 %v281_v25, %v280_v24 }
 0x11e   :  { %469 = vmatpush3.bf16.msra.mxu0 %v468_v26 }
 0x11f   :  { %v282_v27 = vpop.trf.xlu0  ;;  %470 = vmatprep.subr.bf16.mxu0 %v585_v57 }
 0x123   :  { %v283_v28 = vpop.trf.xlu0 }
 0x124   :  { %v471_v29 = vpack.c.bf16 %v283_v28, %v282_v27 }
 0x126   :  { %472 = vmatpush3.bf16.msra.mxu0 %v471_v29 }
 0x127   :  { %v284_v30 = vpop.trf.xlu0  ;;  %473 = vmatprep.subr.bf16.mxu0 %v585_v57 }
 0x12b   :  { %v285_v31 = vpop.trf.xlu0 }
 0x12c   :  { %v474_v32 = vpack.c.bf16 %v285_v31, %v284_v30 }
 0x12e   :  { %475 = vmatpush3.bf16.msra.mxu0 %v474_v32 }
 0x12f   :  { %v286_v33 = vpop.trf.xlu0  ;;  %476 = vmatprep.subr.bf16.mxu0 %v585_v57 }
 0x133   :  { %v287_v34 = vpop.trf.xlu0 }
 0x134   :  { %v477_v35 = vpack.c.bf16 %v287_v34, %v286_v33 }
 0x136   :  { %478 = vmatpush3.bf16.msra.mxu0 %v477_v35 }
 0x137   :  { %v288_v36 = vpop.trf.xlu0  ;;  %479 = vmatprep.subr.bf16.mxu0 %v585_v57 }
 0x13b   :  { %v289_v37 = vpop.trf.xlu0 }
 0x13c   :  { %v480_v38 = vpack.c.bf16 %v289_v37, %v288_v36 }
 0x13e   :  { %481 = vmatpush3.bf16.msra.mxu0 %v480_v38 }
 0x13f   :  { %v290_v39 = vpop.trf.xlu0  ;;  %482 = vmatprep.subr.bf16.mxu0 %v585_v57 }
 0x143   :  { %v291_v40 = vpop.trf.xlu0 }
 0x144   :  { %v483_v41 = vpack.c.bf16 %v291_v40, %v290_v39 }
 0x146   :  { %484 = vmatpush3.bf16.msra.mxu0 %v483_v41 }
 0x147   :  { %v292_v42 = vpop.trf.xlu0  ;;  %485 = vmatprep.subr.bf16.mxu0 %v585_v57 }
 0x14b   :  { %v293_v43 = vpop.trf.xlu0 }
 0x14c   :  { %v486_v44 = vpack.c.bf16 %v293_v43, %v292_v42 }
 0x14e   :  { %487 = vmatpush3.bf16.msra.mxu0 %v486_v44 }
 0x14f   :  { %v294_v45 = vpop.trf.xlu0  ;;  %488 = vmatprep.subr.bf16.mxu0 %v585_v57 }
 0x153   :  { %v295_v46 = vpop.trf.xlu0 }
 0x154   :  { %v489_v47 = vpack.c.bf16 %v295_v46, %v294_v45 }
 0x156   :  { %490 = vmatpush3.bf16.msra.mxu0 %v489_v47 }
 0x159   :  { %465 = vmatmul.mubr.f32.vlgmr.msra.gmra.mrb[0].mxu0 %v312_v48 }
 0x22c   :  { %v395_v49 = vpop.f32.mrb[0].mxu0 }
 0x22d   :  { %399 = vst [vmem:[#allocation6] sm:$0xff] %v395_v49  ;;  %v466_v50 = vpop.f32.mrb[1].mxu0 }
 0x22e   :  { %566 = shalt.err (!%p563_p12)
}
 0x22f   :  { %s567_s16 = scalar_lea.hbm %s777_s4, 128 }
 0x230   :  { %p568_p13 = scmp.ne.s32.totalorder %s777_s4, %s567_s16  ;;  %p571_p0 = scmp.lt.u32.totalorder %s567_s16, %s777_s4 }
 0x232   :  { %p573_p1 = pnand %p571_p0, %p568_p13 }
 0x234   :  { %576 = shalt.err (!%p573_p1)
}
 0x235   :  { %409 = dma.vmem_to_hbm [thread:$0]  %s407_s0, 128, %s777_s4, [#allocation5]  }
 0x236   :  { %579 = dma.done.wait [#allocation5], 128  }
 0x237   :  { %580 = vsyncadd [#allocation5], 4294967168 }
 0x238   :  { %413 = vsyncpa [#allocation4], 1 }
 0x239   :  { %414 = vsyncpa [#allocation5], 1 }

</bundles_post_ra>
